<compile_context>
chip_gen: v6e
topology: v6e:2x2x1
jax: 0.10.0
libtpu: 0.0.40
codegen_flags: <defaults>
</compile_context>

<pallas_src>
import jax
import jax.numpy as jnp
from jax.experimental import pallas as pl
from jax.experimental.pallas import tpu as pltpu


_LANE_TILE = 8192   # fast path: lanes per grid step once batch > _LANE_TILE
_BATCH_TILE = 512   # general path: rows per grid step once batch > _BATCH_TILE


# --------------------------------------------------------------------------
# Fast path kernel: n_feature == 1, n_output == 1.  Pure VPU/XLU, batch on
# lanes, packed params (one VMEM buffer), scalar bias in SMEM.
# --------------------------------------------------------------------------
def _mlp_lane_dense_kernel(x_ref, wp_ref, b2_ref, o_ref):
    # x_ref : (1, B)  batch on lanes (lane-dense)
    # wp_ref: (H, 3)  packed params: [:,0]=w1 col, [:,1]=b1 col, [:,2]=w2 col
    # b2_ref: (1, 1)  scalar output bias (SMEM)
    # o_ref : (1, B)
    x = x_ref[...]                                   # (1, B)
    wp = wp_ref[...]                                 # (H, 3) — single load
    w1c = wp[:, 0:1]                                 # static lane slices: free
    b1c = wp[:, 1:2]
    w2c = wp[:, 2:3]
    # Hidden layer: broadcast multiply over lanes + ReLU (VPU only, no MXU).
    h = jnp.maximum(w1c * x + b1c, 0.0)              # (H, B)
    # Output layer: multiply + sublane reduction (XLU), accumulate in f32.
    prod = w2c.astype(jnp.float32) * h.astype(jnp.float32)
    y = jnp.sum(prod, axis=0, keepdims=True)         # (1, B) f32
    o_ref[...] = (y + b2_ref[0, 0]).astype(o_ref.dtype)


# --------------------------------------------------------------------------
# General path kernel: arbitrary (n_feature, n_hidden, n_output) — MXU.
# --------------------------------------------------------------------------
def _mlp_mxu_kernel(x_ref, w1_ref, b1_ref, w2_ref, b2_ref, o_ref):
    h = jnp.dot(x_ref[...], w1_ref[...], preferred_element_type=jnp.float32)
    h = jnp.maximum(h + b1_ref[...], 0.0)
    y = jnp.dot(h, w2_ref[...], preferred_element_type=jnp.float32) + b2_ref[...]
    o_ref[...] = y.astype(o_ref.dtype)


@jax.jit
def net_forward(x, w1, b1, w2, b2):
    """2-layer MLP forward (ReLU hidden) as a Pallas TPU kernel.

    x : (batch, n_feature)
    w1: (n_feature, n_hidden)   b1: (1, n_hidden)
    w2: (n_hidden, n_output)    b2: (1, n_output)
    returns (batch, n_output)
    """
    batch, n_feature = x.shape
    n_hidden = w1.shape[1]
    n_output = w2.shape[1]
    vmem = pltpu.MemorySpace.VMEM
    smem = pltpu.MemorySpace.SMEM

    if n_feature == 1 and n_output == 1:
        # ---- lane-dense VPU fast path (the actual spec shapes) -------------
        x_row = x.reshape(1, batch)                  # (B,1) -> (1,B): pure reshape
        wp = jnp.concatenate(                        # (H,3): one DMA for all params
            [w1.reshape(n_hidden, 1),
             b1.reshape(n_hidden, 1),
             w2.reshape(n_hidden, 1)], axis=1)
        b2_s = b2.reshape(1, 1)

        if batch <= _LANE_TILE:
            # Grid-less: whole problem VMEM-resident, no padding, no slice.
            out_row = pl.pallas_call(
                _mlp_lane_dense_kernel,
                out_shape=jax.ShapeDtypeStruct((1, batch), x.dtype),
                in_specs=[
                    pl.BlockSpec(memory_space=vmem),   # x   (1, B)
                    pl.BlockSpec(memory_space=vmem),   # wp  (H, 3)
                    pl.BlockSpec(memory_space=smem),   # b2  (1, 1) scalar
                ],
                out_specs=pl.BlockSpec(memory_space=vmem),
            )(x_row, wp, b2_s)
            return out_row.reshape(batch, n_output)

        # Large batch: grid over the lane (batch) axis so the (H, tile)
        # hidden intermediate stays bounded; "parallel" shards steps across
        # v7x's 2 TensorCores (no effect on v5e/v6e).
        bp = pl.cdiv(batch, _LANE_TILE) * _LANE_TILE
        x_row = jnp.pad(x_row, ((0, 0), (0, bp - batch)))
        out_row = pl.pallas_call(
            _mlp_lane_dense_kernel,
            out_shape=jax.ShapeDtypeStruct((1, bp), x.dtype),
            grid=(bp // _LANE_TILE,),
            in_specs=[
                pl.BlockSpec((1, _LANE_TILE), lambda i: (0, i)),
                pl.BlockSpec(memory_space=vmem),       # packed params, resident
                pl.BlockSpec(memory_space=smem),       # scalar bias
            ],
            out_specs=pl.BlockSpec((1, _LANE_TILE), lambda i: (0, i)),
            compiler_params=pltpu.CompilerParams(
                dimension_semantics=("parallel",),
                # Budgeted against v7x's 64 MiB physical / 32 MiB default scope.
                vmem_limit_bytes=32 * 1024 * 1024,
            ),
        )(x_row, wp, b2_s)
        # Padded tail lanes compute relu(b1)*w2 + b2 garbage; truncate here.
        return out_row[0, :batch].reshape(batch, n_output)

    # ---- general MXU path ---------------------------------------------------
    # TODO(synk): shapes with F,H,O < 128 underfill the MXU; a VPU broadcast
    # formulation would be faster for such degenerate contractions.
    if batch <= _BATCH_TILE:
        return pl.pallas_call(
            _mlp_mxu_kernel,
            out_shape=jax.ShapeDtypeStruct((batch, n_output), x.dtype),
            in_specs=[pl.BlockSpec(memory_space=vmem)] * 5,
            out_specs=pl.BlockSpec(memory_space=vmem),
        )(x, w1, b1, w2, b2)

    # Large batch: tile only the M (batch) axis — weights are tiny for this
    # module, so they stay fully VMEM-resident while x/out are pipelined.
    bp = pl.cdiv(batch, _BATCH_TILE) * _BATCH_TILE
    xp = jnp.pad(x, ((0, bp - batch), (0, 0)))
    out = pl.pallas_call(
        _mlp_mxu_kernel,
        out_shape=jax.ShapeDtypeStruct((bp, n_output), x.dtype),
        grid=(bp // _BATCH_TILE,),
        in_specs=[
            pl.BlockSpec((_BATCH_TILE, n_feature), lambda i: (i, 0)),
            pl.BlockSpec(memory_space=vmem),   # w1
            pl.BlockSpec(memory_space=vmem),   # b1
            pl.BlockSpec(memory_space=vmem),   # w2
            pl.BlockSpec(memory_space=vmem),   # b2
        ],
        out_specs=pl.BlockSpec((_BATCH_TILE, n_output), lambda i: (i, 0)),
        compiler_params=pltpu.CompilerParams(
            dimension_semantics=("parallel",),
            vmem_limit_bytes=32 * 1024 * 1024,
        ),
    )(xp, w1, b1, w2, b2)
    return out[:batch]


def init_params(key, n_feature, n_hidden, n_output, dtype=jnp.float32):
    """Deterministic init mimicking torch.nn.Linear's U(-1/sqrt(fan_in), +1/sqrt(fan_in))."""
    k1, k2, k3, k4 = jax.random.split(key, 4)
    bound1 = 1.0 / (n_feature ** 0.5)
    bound2 = 1.0 / (n_hidden ** 0.5)
    w1 = jax.random.uniform(k1, (n_feature, n_hidden), dtype, -bound1, bound1)
    b1 = jax.random.uniform(k2, (1, n_hidden), dtype, -bound1, bound1)
    w2 = jax.random.uniform(k3, (n_hidden, n_output), dtype, -bound2, bound2)
    b2 = jax.random.uniform(k4, (1, n_output), dtype, -bound2, bound2)
    return w1, b1, w2, b2


def _ref_forward(x, w1, b1, w2, b2):
    return jnp.maximum(x @ w1 + b1, 0.0) @ w2 + b2


if __name__ == "__main__":
    key = jax.random.PRNGKey(0)

    # ---- 1) The original problem: x = unsqueeze(linspace(-1, 1, 100), dim=1) ----
    n_feature, n_hidden, n_output = 1, 32, 1
    x = jnp.linspace(-1.0, 1.0, 100, dtype=jnp.float32).reshape(100, 1)
    w1, b1, w2, b2 = init_params(key, n_feature, n_hidden, n_output)

    out = jax.block_until_ready(net_forward(x, w1, b1, w2, b2))
    ref = _ref_forward(x, w1, b1, w2, b2)
    assert out.shape == (100, n_output)
    assert jnp.allclose(out, ref, atol=1e-5, rtol=1e-5)

    # ---- 2) Sanity-check the general MXU path with wider (small) shapes ----
    k2 = jax.random.PRNGKey(1)
    f2, h2, o2, b2n = 8, 64, 4, 64
    xg = jax.random.normal(k2, (b2n, f2), jnp.float32)
    pw1, pb1, pw2, pb2 = init_params(k2, f2, h2, o2)
    outg = jax.block_until_ready(net_forward(xg, pw1, pb1, pw2, pb2))
    refg = _ref_forward(xg, pw1, pb1, pw2, pb2)
    assert outg.shape == (b2n, o2)
    assert jnp.allclose(outg, refg, atol=1e-4, rtol=1e-4)

    print("KERNEL_OK")
</pallas_src>

<mosaic_0001>
module attributes {stable_mosaic.version = 11 : i64} {
  func.func @_mlp_lane_dense_kernel(%arg0: memref<1x100xf32, #tpu.memory_space<vmem>>, %arg1: memref<32x3xf32, #tpu.memory_space<vmem>>, %arg2: memref<1x1xf32, #tpu.memory_space<smem>>, %arg3: memref<1x100xf32, #tpu.memory_space<vmem>>) attributes {dimension_semantics = [], scalar_prefetch = 0 : i64, scratch_operands = 0 : i64, tpu.core_type = #tpu.core_type<tc>} {
    %c0 = arith.constant 0 : index
    %c0_0 = arith.constant 0 : index
    %0 = vector.load %arg0[%c0, %c0_0] : memref<1x100xf32, #tpu.memory_space<vmem>>, vector<1x100xf32>
    %c0_1 = arith.constant 0 : index
    %c0_2 = arith.constant 0 : index
    %1 = vector.load %arg1[%c0_1, %c0_2] : memref<32x3xf32, #tpu.memory_space<vmem>>, vector<32x3xf32>
    %2 = vector.extract_strided_slice %1 {offsets = [0, 0], sizes = [32, 1], strides = [1, 1]} : vector<32x3xf32> to vector<32x1xf32>
    %3 = vector.extract_strided_slice %1 {offsets = [0, 1], sizes = [32, 1], strides = [1, 1]} : vector<32x3xf32> to vector<32x1xf32>
    %4 = vector.extract_strided_slice %1 {offsets = [0, 2], sizes = [32, 1], strides = [1, 1]} : vector<32x3xf32> to vector<32x1xf32>
    %5 = vector.broadcast %2 : vector<32x1xf32> to vector<32x100xf32>
    %6 = vector.broadcast %0 : vector<1x100xf32> to vector<32x100xf32>
    %7 = arith.mulf %5, %6 : vector<32x100xf32>
    %8 = vector.broadcast %3 : vector<32x1xf32> to vector<32x100xf32>
    %9 = arith.addf %7, %8 : vector<32x100xf32>
    %cst = arith.constant 0.000000e+00 : f32
    %10 = vector.broadcast %cst : f32 to vector<32x100xf32>
    %11 = arith.maximumf %9, %10 : vector<32x100xf32>
    %12 = vector.broadcast %4 : vector<32x1xf32> to vector<32x100xf32>
    %13 = arith.mulf %12, %11 : vector<32x100xf32>
    %cst_3 = arith.constant dense<0.000000e+00> : vector<100xf32>
    %14 = vector.multi_reduction <add>, %13, %cst_3 [0] : vector<32x100xf32> to vector<100xf32>
    %15 = vector.shape_cast %14 : vector<100xf32> to vector<1x100xf32>
    %c0_4 = arith.constant 0 : index
    %c0_5 = arith.constant 0 : index
    %16 = memref.load %arg2[%c0_4, %c0_5] : memref<1x1xf32, #tpu.memory_space<smem>>
    %17 = vector.broadcast %16 : f32 to vector<1x100xf32>
    %18 = arith.addf %15, %17 : vector<1x100xf32>
    %c0_6 = arith.constant 0 : index
    %c0_7 = arith.constant 0 : index
    %19 = vector.load %arg3[%c0_6, %c0_7] : memref<1x100xf32, #tpu.memory_space<vmem>>, vector<1x100xf32>
    tpu.vector_store %arg3[%c0_6, %c0_7], %18 {strides = array<i32>} : memref<1x100xf32, #tpu.memory_space<vmem>>, vector<1x100xf32>,
    return
  }
}

</mosaic_0001>

<bundles_post_ra>
// kernel: net_forward.1
= control target key start
LH: loop header
LB: loop body
LE: loop exit
PB: predicated region body
PF: predicated region fallthrough
CT: control target
= control target key end

     0   :  { %v163_v2 = vmov 0   ;;  %s208_s0 = inlined_call_operand.vmem [shape: f32[1,100], index: 0, kind: input, shape index: {}]   ;;  %s209_s1 = inlined_call_operand.vmem [shape: f32[32,3], index: 1, kind: input, shape index: {}]   ;;  %s210_s2 = inlined_call_operand.<no memory space> [shape: f32[1,1], index: 2, kind: input, shape index: {}]   ;;  %s211_s3 = inlined_call_operand.hbm [shape: f32[1,100], index: 3, kind: output, shape index: {}]  }
   0x1   :  { %v19_v0 = vld [vmem:[%s209_s1 + $0x10] sm:$0xff]  ;;  %v17_v1 = vld [vmem:[%s209_s1] sm:$0xff]  ;;  %134 = vset.pattern.permute.xlu1 %v163_v2  ;;  %133 = vset.pattern.permute.xlu0 %v163_v2 }
   0x2   :  { %9 = vsyncpa [#allocation4], 0  ;;  %33 = vperm.xlu1 %134, %v19_v0   ;;  %23 = vperm.xlu0 %133, %v17_v1   ;;  %v18_v3 = vld [vmem:[%s209_s1 + $0x8] sm:$0xff]  ;;  %v164_v4 = vmov 1   ;;  %v20_v5 = vld [vmem:[%s209_s1 + $0x18] sm:$0xff]  ;;  %v165_v6 = vmov 2   ;;  %v110_v48 = vstv %s210_s2 }
   0x3   :  { %v128_v12 = vld [vmem:[%s208_s0] ss:$0 sm:$0xff]  ;;  %vm95_vm0 = vcmask 818176   ;;  %s166_s22 = smov [#allocation3]   ;;  %vm112_vm1 = vcmask 811008  }
   0x4   :  { %s120_s23 = sshll.u32 %s166_s22, 4  ;;  %s121_s23 = int_to_ptr.vmem [resolvable:$true] %s120_s23 }
   0x5   :  { %s141_s24 = scalar_lea.vmem %s121_s23, 16  ;;  %s145_s25 = scalar_lea.vmem %s121_s23, 32 }
   0x6   :  { %135 = vset.pattern.permute.xlu1 %v164_v4  ;;  %28 = vperm.xlu0 %133, %v18_v3   ;;  %p142_p0 = scmp.ne.s32.totalorder %s121_s23, %s141_s24  ;;  %p146_p1 = scmp.lt.s32.totalorder %s121_s23, %s121_s23 }
   0x7   :  { %52 = vperm.xlu1 %135, %v17_v1   ;;  %p147_p2 = scmp.lt.s32.totalorder %s145_s25, %s141_s24 }
   0x9   :  { %p148_p3 = por %p147_p2, %p146_p1 }
   0xa   :  { %136 = vset.pattern.permute.xlu0 %v164_v4 }
   0xb   :  { %137 = vset.pattern.permute.xlu1 %v163_v2  ;;  %56 = vperm.xlu0 %136, %v18_v3   ;;  %p149_p4 = pnand %p148_p3, %p142_p0 }
   0xc   :  { %38 = vperm.xlu1 %137, %v20_v5  }
   0xf   :  { %64 = vperm.xlu0 %136, %v20_v5  }
  0x10   :  { %138 = vset.pattern.permute.xlu1 %v164_v4 }
  0x11   :  { %60 = vperm.xlu1 %138, %v19_v0  }
  0x13   :  { %140 = vset.pattern.permute.xlu0 %v165_v6 }
  0x14   :  { %80 = vperm.xlu0 %140, %v18_v3  }
  0x15   :  { %139 = vset.pattern.permute.xlu1 %v165_v6 }
  0x16   :  { %76 = vperm.xlu1 %139, %v17_v1  }
  0x1a   :  { %84 = vperm.xlu1 %139, %v19_v0  }
  0x1e   :  { %88 = vperm.xlu1 %139, %v20_v5  }
  0x7d   :  { %v34_v7 = vpop.permute.xlu1 %33  ;;  %v24_v8 = vpop.permute.xlu0 %23 }
  0x7e   :  { %v47_v14 = vmul.f32 %v128_v12, %v24_v8  ;;  %v49_v19 = vmul.f32 %v128_v12, %v34_v7 }
  0x81   :  { %v29_v9 = vpop.permute.xlu0 %28 }
  0x82   :  { %v53_v10 = vpop.permute.xlu1 %52  ;;  %v48_v15 = vmul.f32 %v128_v12, %v29_v9 }
  0x83   :  { %v67_v17 = vadd.f32 %v53_v10, %v47_v14 }
  0x85   :  { %v71_v21 = vmax.f32 %v67_v17, 0.0 }
  0x86   :  { %v57_v11 = vpop.permute.xlu0 %56 }
  0x87   :  { %v39_v13 = vpop.permute.xlu1 %38  ;;  %v68_v20 = vadd.f32 %v57_v11, %v48_v15 }
  0x88   :  { %v50_v22 = vmul.f32 %v128_v12, %v39_v13 }
  0x89   :  { %v72_v26 = vmax.f32 %v68_v20, 0.0 }
  0x8a   :  { %v65_v16 = vpop.permute.xlu0 %64 }
  0x8b   :  { %v70_v28 = vadd.f32 %v65_v16, %v50_v22 }
  0x8c   :  { %v61_v18 = vpop.permute.xlu1 %60 }
  0x8d   :  { %v69_v23 = vadd.f32 %v61_v18, %v49_v19  ;;  %v74_v34 = vmax.f32 %v70_v28, 0.0 }
  0x8f   :  { %v81_v24 = vpop.permute.xlu0 %80  ;;  %v73_v29 = vmax.f32 %v69_v23, 0.0 }
  0x90   :  { %v92_v30 = vmul.f32 %v81_v24, %v72_v26 }
  0x91   :  { %v77_v25 = vpop.permute.xlu1 %76 }
  0x92   :  { %v91_v27 = vmul.f32 %v77_v25, %v71_v21  ;;  %v97_v35 = vsel %vm95_vm0, %v92_v30, 0.0 }
  0x94   :  { %v96_v32 = vsel %vm95_vm0, %v91_v27, 0.0 }
  0x95   :  { %v85_v31 = vpop.permute.xlu1 %84  ;;  %v98_v37 = vadd.f32 %v97_v35, %v96_v32 }
  0x96   :  { %v93_v33 = vmul.f32 %v85_v31, %v73_v29 }
  0x98   :  { %v99_v36 = vsel %vm95_vm0, %v93_v33, 0.0 }
  0x99   :  { %v89_v38 = vpop.permute.xlu1 %88  ;;  %v100_v40 = vadd.f32 %v99_v36, %v98_v37 }
  0x9a   :  { %v94_v39 = vmul.f32 %v89_v38, %v74_v34 }
  0x9c   :  { %v101_v41 = vsel %vm95_vm0, %v94_v39, 0.0 }
  0x9d   :  { %v102_v42 = vadd.f32 %v101_v41, %v100_v40 }
  0x9f   :  { %v103_v43 = vrot.slane %v102_v42, 4 }
  0xa1   :  { %v104_v44 = vadd.f32 %v103_v43, %v102_v42 }
  0xa3   :  { %v105_v45 = vrot.slane %v104_v44, 2 }
  0xa5   :  { %v106_v46 = vadd.f32 %v105_v45, %v104_v44 }
  0xa7   :  { %v107_v47 = vrot.slane %v106_v46, 1 }
  0xa9   :  { %v108_v49 = vadd.f32 %v107_v47, %v106_v46 }
  0xab   :  { %v111_v50 = vadd.f32 %v110_v48, %v108_v49 }
  0xad   :  { %113 = vst.msk [vmem:[#allocation3] sm:$0x1] %vm112_vm1, %v111_v50 }
  0xae   :  { %152 = shalt.err (!%p149_p4)
}
  0xaf   :  { %123 = dma.vmem_to_hbm [thread:$0]  %s121_s23, 16, %s211_s3, [#allocation4]  }
  0xb0   :  { %161 = dma.done.wait [#allocation4], 16  }
  0xb1   :  { %162 = vsyncadd [#allocation4], 4294967280 }
  0xb2   :  { %127 = vsyncpa [#allocation4], 1 }

</bundles_post_ra>
